<compile_context>
chip_gen: v5e
topology: v5e:2x2
jax: 0.10.0
libtpu: 0.0.40
codegen_flags: <defaults>
</compile_context>

<pallas_src>
import functools

import jax
import jax.numpy as jnp
from jax.experimental import pallas as pl
from jax.experimental.pallas import tpu as pltpu


def _highway_kernel(x_ref, w_ref, b_ref, o_ref):
    """One (tm, EP) row-packed tile.

    y = [proj | gate] = x_bf16 @ W_fused_bf16 + b_fused   (single MXU pass, f32 acc)
    out = x + sigmoid(gate) * (relu(proj) - x)            (f32 blend)
    """
    x = x_ref[...]                                   # (tm, EP), input dtype
    ep = x_ref.shape[-1]
    xf = x.astype(jnp.float32)
    y = jnp.dot(x.astype(jnp.bfloat16), w_ref[...],
                preferred_element_type=jnp.float32) + b_ref[...]
    proj = jnp.maximum(y[:, :ep], 0.0)               # ReLU    (VPU)
    gate = jax.nn.sigmoid(y[:, ep:])                 # Sigmoid (EUP)
    o_ref[...] = (xf + gate * (proj - xf)).astype(o_ref.dtype)


def pack_highway_params(w_proj, b_proj, w_gate, b_gate, *, pack=4):
    """One-time weight prep (keep OUT of the per-call hot path).

    Builds a block-diagonal packed & fused weight (stored in bf16 for the MXU):
      W_fused : (pack*E, 2*pack*E) = [blockdiag(W_proj^T) | blockdiag(W_gate^T)]
      b_fused : (1, 2*pack*E)      kept in f32 (added after f32 accumulation)
    so that `pack` rows of width E are processed as one 128-lane-wide row.
    """
    e = w_proj.shape[0]
    eye = jnp.eye(pack, dtype=jnp.float32)
    wp = jnp.kron(eye, jnp.transpose(w_proj).astype(jnp.float32))   # (pack*e, pack*e)
    wg = jnp.kron(eye, jnp.transpose(w_gate).astype(jnp.float32))   # (pack*e, pack*e)
    w_fused = jnp.concatenate([wp, wg], axis=1).astype(jnp.bfloat16)
    b_fused = jnp.concatenate([jnp.tile(b_proj, pack), jnp.tile(b_gate, pack)])
    b_fused = b_fused.reshape(1, 2 * pack * e).astype(jnp.float32)
    return w_fused, b_fused


@functools.partial(jax.jit, static_argnames=("pack", "tm"))
def highway_pallas(x, w_fused, b_fused, *, pack=4, tm=4096):
    """x: (..., E).  w_fused/b_fused: from pack_highway_params (same pack)."""
    orig_shape = x.shape
    e = orig_shape[-1]
    ep = pack * e                      # packed lane width (128 for E=32, pack=4)

    x2d = x.reshape(-1, e)
    n = x2d.shape[0]

    # Only pad to `pack` alignment (<= pack-1 rows), and skip it entirely when
    # n % pack == 0 (statically known).  No tile-multiple padding: the grid uses
    # cdiv and Pallas masks the partial final block.
    pad_rows = (-n) % pack
    if pad_rows:
        x2d = jnp.pad(x2d, ((0, pad_rows), (0, 0)))
    m = (n + pad_rows) // pack
    xp = x2d.reshape(m, ep)                          # lane-dense packed slab

    # Row tile: 8-aligned, capped by requested tm, and capped so the grid has
    # >= 2 steps (keeps both v7x TensorCores busy).  Tiny inputs use one block
    # whose row extent equals the full array (allowed by the (8,128) rule).
    if m <= 8:
        tm_eff = m
    else:
        cap = ((pl.cdiv(m, 2) + 7) // 8) * 8
        tm_eff = max(8, (min(tm, cap) // 8) * 8)
    grid = pl.cdiv(m, tm_eff)

    itemsize = jnp.dtype(x.dtype).itemsize
    cost = pl.CostEstimate(
        flops=2 * m * ep * (2 * ep) + 6 * m * ep,
        transcendentals=m * ep,
        bytes_accessed=(2 * m * ep * itemsize
                        + w_fused.size * jnp.dtype(w_fused.dtype).itemsize
                        + b_fused.size * jnp.dtype(b_fused.dtype).itemsize),
    )

    out = pl.pallas_call(
        _highway_kernel,
        out_shape=jax.ShapeDtypeStruct((m, ep), x.dtype),
        grid_spec=pltpu.PrefetchScalarGridSpec(
            num_scalar_prefetch=0,
            grid=(grid,),
            in_specs=[
                pl.BlockSpec((tm_eff, ep), lambda i: (i, 0)),    # packed x tile
                pl.BlockSpec((ep, 2 * ep), lambda i: (0, 0)),    # fused bf16 weight (resident)
                pl.BlockSpec((1, 2 * ep), lambda i: (0, 0)),     # fused f32 bias (resident)
            ],
            out_specs=pl.BlockSpec((tm_eff, ep), lambda i: (i, 0)),
        ),
        compiler_params=pltpu.CompilerParams(
            dimension_semantics=("parallel",),   # row axis shards across TCs (v7x)
        ),
        cost_estimate=cost,
    )(xp, w_fused, b_fused)

    out = out.reshape(m * pack, e)
    if pad_rows:
        out = out[:n]
    return out.reshape(orig_shape)


def highway_ref(x, w_proj, b_proj, w_gate, b_gate):
    """Pure-JAX reference matching the PyTorch module."""
    x_proj = jax.nn.relu(x @ w_proj.T + b_proj)
    x_gate = jax.nn.sigmoid(x @ w_gate.T + b_gate)
    return x_gate * x_proj + (1.0 - x_gate) * x


if __name__ == "__main__":
    e_word = 32
    batch, seq = 2, 8

    key = jax.random.PRNGKey(0)
    kx, kwp, kbp, kwg, kbg, kx2 = jax.random.split(key, 6)

    # Deterministic synthetic parameters (PyTorch Linear shapes: (out, in), (out,)).
    bound = 1.0 / (e_word ** 0.5)
    x = jax.random.normal(kx, (batch, seq, e_word), dtype=jnp.float32)
    w_proj = jax.random.uniform(kwp, (e_word, e_word), jnp.float32, -bound, bound)
    b_proj = jax.random.uniform(kbp, (e_word,), jnp.float32, -bound, bound)
    w_gate = jax.random.uniform(kwg, (e_word, e_word), jnp.float32, -bound, bound)
    b_gate = jax.random.uniform(kbg, (e_word,), jnp.float32, -bound, bound)

    # One-time weight packing (outside the per-call hot path).
    pack = 4
    w_fused, b_fused = pack_highway_params(w_proj, b_proj, w_gate, b_gate, pack=pack)
    w_fused = jax.block_until_ready(w_fused)
    b_fused = jax.block_until_ready(b_fused)

    # bf16 MXU operands (f32 accumulation) -> compare at a relaxed tolerance.
    tol = dict(atol=3e-2, rtol=3e-2)

    # Small shape from the module spec (batch=2, seq=8, e_word=32).
    out = highway_pallas(x, w_fused, b_fused, pack=pack)
    out = jax.block_until_ready(out)
    ref = highway_ref(x, w_proj, b_proj, w_gate, b_gate)
    assert out.shape == ref.shape
    assert jnp.allclose(out, ref, **tol), "mismatch vs reference (small)"

    # Odd shape: exercises the pack-alignment pad, multi-step grid, and the
    # masked partial final block.
    x2 = jax.random.normal(kx2, (3, 37, e_word), dtype=jnp.float32)
    out2 = jax.block_until_ready(highway_pallas(x2, w_fused, b_fused, pack=pack))
    ref2 = highway_ref(x2, w_proj, b_proj, w_gate, b_gate)
    assert out2.shape == ref2.shape
    assert jnp.allclose(out2, ref2, **tol), "mismatch vs reference (odd shape)"

    print("KERNEL_OK")
</pallas_src>

<mosaic_0001>
module attributes {stable_mosaic.version = 11 : i64} {
  func.func @_highway_kernel(%arg0: i32, %arg1: memref<4x128xf32, #tpu.memory_space<vmem>>, %arg2: memref<128x256xbf16, #tpu.memory_space<vmem>>, %arg3: memref<1x256xf32, #tpu.memory_space<vmem>>, %arg4: memref<4x128xf32, #tpu.memory_space<vmem>>) attributes {dimension_semantics = [#tpu.dimension_semantics<parallel>], iteration_bounds = array<i64: 1>, scalar_prefetch = 0 : i64, scratch_operands = 0 : i64, tpu.core_type = #tpu.core_type<tc>, window_params = [{transform_indices = @transform_0, window_bounds = array<i64: 4, 128>}, {pipeline_mode = #tpu.pipeline_mode<synchronous>, transform_indices = @transform_1, window_bounds = array<i64: 128, 256>}, {pipeline_mode = #tpu.pipeline_mode<synchronous>, transform_indices = @transform_2, window_bounds = array<i64: 1, 256>}, {transform_indices = @transform_3, window_bounds = array<i64: 4, 128>}]} {
    %c0 = arith.constant 0 : index
    %c0_0 = arith.constant 0 : index
    %0 = vector.load %arg1[%c0, %c0_0] : memref<4x128xf32, #tpu.memory_space<vmem>>, vector<4x128xf32>
    %1 = arith.truncf %0 : vector<4x128xf32> to vector<4x128xbf16>
    %c0_1 = arith.constant 0 : index
    %c0_2 = arith.constant 0 : index
    %2 = vector.load %arg2[%c0_1, %c0_2] : memref<128x256xbf16, #tpu.memory_space<vmem>>, vector<128x256xbf16>
    %cst = arith.constant dense<0.000000e+00> : vector<4x256xf32>
    %3 = tpu.matmul %1, %2, %cst {dimension_numbers = #tpu.dot_dimension_numbers<[1], [0], [0], [1], [0, 0, 1, 1], [], []>} : vector<4x128xbf16>, vector<128x256xbf16>, vector<4x256xf32> -> vector<4x256xf32>
    %c0_3 = arith.constant 0 : index
    %c0_4 = arith.constant 0 : index
    %4 = vector.load %arg3[%c0_3, %c0_4] : memref<1x256xf32, #tpu.memory_space<vmem>>, vector<1x256xf32>
    %5 = vector.broadcast %4 : vector<1x256xf32> to vector<4x256xf32>
    %6 = arith.addf %3, %5 : vector<4x256xf32>
    %7 = vector.extract_strided_slice %6 {offsets = [0, 0], sizes = [4, 128], strides = [1, 1]} : vector<4x256xf32> to vector<4x128xf32>
    %cst_5 = arith.constant 0.000000e+00 : f32
    %8 = vector.broadcast %cst_5 : f32 to vector<4x128xf32>
    %9 = arith.maximumf %7, %8 : vector<4x128xf32>
    %10 = vector.extract_strided_slice %6 {offsets = [0, 128], sizes = [4, 128], strides = [1, 1]} : vector<4x256xf32> to vector<4x128xf32>
    %11 = arith.negf %10 : vector<4x128xf32>
    %12 = math.exp %11 : vector<4x128xf32>
    %cst_6 = arith.constant 1.000000e+00 : f32
    %13 = vector.broadcast %cst_6 : f32 to vector<4x128xf32>
    %14 = arith.addf %13, %12 : vector<4x128xf32>
    %15 = arith.divf %13, %14 : vector<4x128xf32>
    %16 = arith.subf %9, %0 : vector<4x128xf32>
    %17 = arith.mulf %15, %16 : vector<4x128xf32>
    %18 = arith.addf %0, %17 : vector<4x128xf32>
    %c0_7 = arith.constant 0 : index
    %c0_8 = arith.constant 0 : index
    %19 = vector.load %arg4[%c0_7, %c0_8] : memref<4x128xf32, #tpu.memory_space<vmem>>, vector<4x128xf32>
    tpu.vector_store %arg4[%c0_7, %c0_8], %18 {strides = array<i32>} : memref<4x128xf32, #tpu.memory_space<vmem>>, vector<4x128xf32>,
    return
  }
  func.func @transform_0(%arg0: i32) -> (i32, i32) {
    %c0_i32 = arith.constant 0 : i32
    %c0_i32_0 = arith.constant 0 : i32
    return %arg0, %c0_i32 : i32, i32
  }
  func.func @transform_1(%arg0: i32) -> (i32, i32) {
    %c0_i32 = arith.constant 0 : i32
    %c0_i32_0 = arith.constant 0 : i32
    %c0_i32_1 = arith.constant 0 : i32
    return %c0_i32, %c0_i32_0 : i32, i32
  }
  func.func @transform_2(%arg0: i32) -> (i32, i32) {
    %c0_i32 = arith.constant 0 : i32
    %c0_i32_0 = arith.constant 0 : i32
    %c0_i32_1 = arith.constant 0 : i32
    return %c0_i32, %c0_i32_0 : i32, i32
  }
  func.func @transform_3(%arg0: i32) -> (i32, i32) {
    %c0_i32 = arith.constant 0 : i32
    %c0_i32_0 = arith.constant 0 : i32
    return %arg0, %c0_i32 : i32, i32
  }
}

</mosaic_0001>

<bundles_post_ra>
// kernel: highway_pallas.1
= control target key start
LH: loop header
LB: loop body
LE: loop exit
PB: predicated region body
PF: predicated region fallthrough
CT: control target
= control target key end

     0   :  { %8 = vsyncpa [#allocation3], 0  ;;  %s303_s15 = smov [#allocation2]   ;;  %s304_s17 = smov 128   ;;  %s338_s0 = inlined_call_operand.vmem [shape: f32[4,128], index: 0, kind: input, shape index: {}]   ;;  %s339_s1 = inlined_call_operand.hbm [shape: bf16[128,256], index: 1, kind: input, shape index: {}]   ;;  %s340_s2 = inlined_call_operand.vmem [shape: f32[1,256], index: 2, kind: input, shape index: {}]   ;;  %s341_s3 = inlined_call_operand.vmem [shape: f32[4,128], index: 3, kind: output, shape index: {}]  }
   0x1   :  { %s15_s14 = sshll.u32 %s339_s1, 4  ;;  %s17_s16 = sshll.u32 %s303_s15, 4  ;;  %s16_s14 = int_to_ptr.hbm [resolvable:$true] %s15_s14  ;;  %s18_s16 = int_to_ptr.vmem [resolvable:$true] %s17_s16 }
   0x2   :  { %s305_s18 = smov 8  }
   0x3   :  { %23 = dma.hbm_to_vmem [thread:$0]  %s16_s14, 2048, %s18_s16, [#allocation3], %s304_s17, %s304_s17, %s305_s18  }
   0x4   :  { %301 = dma.done.wait [#allocation3], 2048  }
   0x5   :  { %302 = vsyncadd [#allocation3], 4294965248  ;;  %v268_v0 = vld [vmem:[#allocation2 + $0x74] sm:$0xf]  ;;  %v249_v1 = vld [vmem:[#allocation2 + $0x78] sm:$0xf0] }
   0x6   :  { %v266_v2 = vld [vmem:[#allocation2 + $0x64] sm:$0xf]  ;;  %v252_v3 = vor.u32 %v268_v0, %v249_v1  ;;  %v241_v4 = vld [vmem:[#allocation2 + $0x68] sm:$0xf0]  ;;  %v247_v5 = vld [vmem:[#allocation2 + $0x70] sm:$0xf] }
   0x7   :  { %v244_v6 = vor.u32 %v266_v2, %v241_v4  ;;  %v264_v7 = vld [vmem:[#allocation2 + $0x54] sm:$0xf]  ;;  %v269_v8 = vld [vmem:[#allocation2 + $0x74] sm:$0xf0]  ;;  %v233_v9 = vld [vmem:[#allocation2 + $0x58] sm:$0xf0] }
   0x8   :  { %147 = vmatpush.bf16.msra.mxu1 %v252_v3  ;;  %v248_v10 = vor.u32 %v269_v8, %v247_v5  ;;  %v239_v11 = vld [vmem:[#allocation2 + $0x60] sm:$0xf]  ;;  %v267_v12 = vld [vmem:[#allocation2 + $0x64] sm:$0xf0]  ;;  %v236_v14 = vor.u32 %v264_v7, %v233_v9  ;;  %v231_v15 = vld [vmem:[#allocation2 + $0x50] sm:$0xf] }
   0x9   :  { %v240_v13 = vor.u32 %v267_v12, %v239_v11  ;;  %v265_v16 = vld [vmem:[#allocation2 + $0x54] sm:$0xf0]  ;;  %v262_v17 = vld [vmem:[#allocation2 + $0x44] sm:$0xf]  ;;  %v225_v18 = vld [vmem:[#allocation2 + $0x48] sm:$0xf0] }
   0xa   :  { %134 = vmatpush.bf16.msra.mxu0 %v248_v10  ;;  %v232_v19 = vor.u32 %v265_v16, %v231_v15  ;;  %v228_v20 = vor.u32 %v262_v17, %v225_v18  ;;  %v223_v21 = vld [vmem:[#allocation2 + $0x40] sm:$0xf]  ;;  %v263_v22 = vld [vmem:[#allocation2 + $0x44] sm:$0xf0]  ;;  %v260_v23 = vld [vmem:[#allocation2 + $0x34] sm:$0xf] }
   0xb   :  { %v217_v24 = vld [vmem:[#allocation2 + $0x38] sm:$0xf0]  ;;  %v224_v25 = vor.u32 %v263_v22, %v223_v21  ;;  %v215_v27 = vld [vmem:[#allocation2 + $0x30] sm:$0xf]  ;;  %v261_v28 = vld [vmem:[#allocation2 + $0x34] sm:$0xf0] }
   0xc   :  { %148 = vmatpush.bf16.msra.mxu1 %v244_v6  ;;  %v220_v26 = vor.u32 %v260_v23, %v217_v24  ;;  %v258_v29 = vld [vmem:[#allocation2 + $0x24] sm:$0xf]  ;;  %v209_v30 = vld [vmem:[#allocation2 + $0x28] sm:$0xf0]  ;;  %v216_v31 = vor.u32 %v261_v28, %v215_v27  ;;  %v207_v33 = vld [vmem:[#allocation2 + $0x20] sm:$0xf] }
   0xd   :  { %v212_v32 = vor.u32 %v258_v29, %v209_v30  ;;  %v259_v34 = vld [vmem:[#allocation2 + $0x24] sm:$0xf0]  ;;  %v256_v35 = vld [vmem:[#allocation2 + $0x14] sm:$0xf]  ;;  %v201_v36 = vld [vmem:[#allocation2 + $0x18] sm:$0xf0] }
   0xe   :  { %135 = vmatpush.bf16.msra.mxu0 %v240_v13  ;;  %v208_v37 = vor.u32 %v259_v34, %v207_v33  ;;  %v204_v38 = vor.u32 %v256_v35, %v201_v36  ;;  %v199_v39 = vld [vmem:[#allocation2 + $0x10] sm:$0xf]  ;;  %v257_v40 = vld [vmem:[#allocation2 + $0x14] sm:$0xf0]  ;;  %v254_v41 = vld [vmem:[#allocation2 + $0x4] sm:$0xf] }
   0xf   :  { %v193_v42 = vld [vmem:[#allocation2 + $0x8] sm:$0xf0]  ;;  %v200_v43 = vor.u32 %v257_v40, %v199_v39  ;;  %v30_v45 = vld [vmem:[%s338_s0] sm:$0xf]  ;;  %v255_v47 = vld [vmem:[#allocation2 + $0x4] sm:$0xf0] }
  0x10   :  { %149 = vmatpush.bf16.msra.mxu1 %v236_v14  ;;  %v196_v44 = vor.u32 %v254_v41, %v193_v42  ;;  %v191_v46 = vld [vmem:[#allocation2] sm:$0xf]  ;;  %v31_v48 = vpack.c.bf16 %v30_v45, %v30_v45 }
  0x11   :  { %v192_v49 = vor.u32 %v255_v47, %v191_v46  ;;  %v48_v50 = vld [vmem:[%s340_s2] sm:$0x3] }
  0x12   :  { %136 = vmatpush.bf16.msra.mxu0 %v232_v19  ;;  %v51_v51 = vperm.slane %v48_v50, 1  ;;  %v50_v60 = vperm.slane %v48_v50, 0 }
  0x14   :  { %150 = vmatpush.bf16.msra.mxu1 %v228_v20 }
  0x16   :  { %137 = vmatpush.bf16.msra.mxu0 %v224_v25 }
  0x18   :  { %151 = vmatpush.bf16.msra.mxu1 %v220_v26 }
  0x1a   :  { %138 = vmatpush.bf16.msra.mxu0 %v216_v31 }
  0x1c   :  { %152 = vmatpush.bf16.msra.mxu1 %v212_v32 }
  0x1e   :  { %139 = vmatpush.bf16.msra.mxu0 %v208_v37 }
  0x20   :  { %153 = vmatpush.bf16.msra.mxu1 %v204_v38 }
  0x22   :  { %140 = vmatpush.bf16.msra.mxu0 %v200_v43 }
  0x24   :  { %154 = vmatpush.bf16.msra.mxu1 %v196_v44 }
  0x26   :  { %141 = vmatpush.bf16.msra.mxu0 %v192_v49 }
  0x27   :  { %155 = vmatmul.bf16.vlgmr.msra.gmra.mxu1 %v31_v48 }
  0x29   :  { %142 = vmatmul.bf16.vlgmr.msra.gmra.mxu0 %v31_v48 }
  0xa4   :  { %v156_v52 = vpop.f32.mrf.mxu1 }
  0xa5   :  { %v157_v53 = vadd.f32 %v156_v52, %v51_v51 }
  0xa6   :  { %v143_v55 = vpop.f32.mrf.mxu0 }
  0xa7   :  { %v253_v54 = vmul.f32 -1.442695, %v157_v53  ;;  %v144_v61 = vadd.f32 %v143_v55, %v50_v60 }
  0xa9   :  { %273 = vpow2.f32 %v253_v54  ;;  %v160_v1 = vmax.f32 %v144_v61, 0.0 }
  0xab   :  { %v180_v6 = vsub.f32 %v160_v1, %v30_v45 }
  0xac   :  { %v158_v56 = vpop.f32.mrf.mxu1 }
  0xae   :  { %v145_v58 = vpop.f32.mrf.mxu0 }
  0xaf   :  { %v274_v57 = vpop.eup %273 }
  0xb0   :  { %v164_v59 = vadd.f32 1.0, %v274_v57 }
  0xb2   :  { %275 = vrcp.f32 %v164_v59  ;;  %v176_v2 = vand.u32 2147483648, %v164_v59  ;;  %v174_v4 = vand.u32 2147483647, %v164_v59  ;;  %vm170_vm1 = vweird.f32 %v164_v59 }
  0xb4   :  { %v177_v7 = vor.u32 1.1754944e-38, %v176_v2  ;;  %vm175_vm3 = vcmp.eq.f32.partialorder %v174_v4, 8.507059e+37 }
  0xb8   :  { %v276_v62 = vpop.eup %275 }
  0xb9   :  { %v166_v63 = vmul.f32 %v276_v62, %v164_v59  ;;  %vm171_vm0 = vweird.f32 %v276_v62 }
  0xba   :  { %vm172_vm2 = vmor %vm170_vm1, %vm171_vm0 }
  0xbb   :  { %v167_v0 = vsub.f32 1.0, %v166_v63 }
  0xbd   :  { %v168_v3 = vmul.f32 %v276_v62, %v167_v0 }
  0xbf   :  { %v169_v5 = vadd.f32 %v276_v62, %v168_v3 }
  0xc1   :  { %v173_v8 = vsel %vm172_vm2, %v276_v62, %v169_v5 }
  0xc2   :  { %v178_v9 = vsel %vm175_vm3, %v177_v7, %v173_v8 }
  0xc3   :  { %v181_v10 = vmul.f32 %v180_v6, %v178_v9 }
  0xc5   :  { %v182_v11 = vadd.f32 %v181_v10, %v30_v45 }
  0xc7   :  { %183 = vst [vmem:[%s341_s3] sm:$0xf] %v182_v11 }
  0xc8   :  { %188 = vsyncpa [#allocation3], 1 }

</bundles_post_ra>
